<compile_context>
chip_gen: v7x
topology: tpu7x:2x2x1
jax: 0.10.0
libtpu: 0.0.40
codegen_flags: <defaults>
</compile_context>

<pallas_src>
import functools

import jax
import jax.numpy as jnp
from jax.experimental import pallas as pl
from jax.experimental.pallas import tpu as pltpu

BN_EPS = 1e-5
LANE = 128
SUBLANE = 8


def _round_up(x, m):
    return ((x + m - 1) // m) * m


def _bn_relu(h, gamma, beta):
    # BatchNorm1d (training mode: batch mean, biased variance) followed by ReLU.
    mean = jnp.mean(h, axis=0, keepdims=True)
    var = jnp.mean((h - mean) ** 2, axis=0, keepdims=True)
    hn = (h - mean) * jax.lax.rsqrt(var + BN_EPS)
    return jnp.maximum(hn * gamma + beta, 0.0)


def one_step_generator_kernel(k1, r_w2, r_wo, r_vec, in_ref, p_ref, out_ref):
    """Single-invocation kernel: everything lives in VMEM, one grid-less call.

    in_ref : (B, k1)      concatenated [z, x, g]
    p_ref  : (rows, 128)  packed params (see prepare_params for the layout)
    out_ref: (B, 128)     lane-dense output; cols [0, ac_dim) are tanh'd.
    """
    x = in_ref[...].astype(jnp.float32)

    # Static row-slices out of the single packed parameter buffer.
    w1 = p_ref[pl.ds(0, k1), :]            # (k1, 128)  zero-padded cols >= H1
    w2 = p_ref[pl.ds(r_w2, LANE), :]       # (128, 128) zero-padded rows/cols
    wo = p_ref[pl.ds(r_wo, LANE), :]       # (128, 128) zero-padded rows/cols
    g1 = p_ref[pl.ds(r_vec + 0, 1), :]     # (1, 128)
    be1 = p_ref[pl.ds(r_vec + 1, 1), :]
    g2 = p_ref[pl.ds(r_vec + 2, 1), :]
    be2 = p_ref[pl.ds(r_vec + 3, 1), :]
    bo = p_ref[pl.ds(r_vec + 4, 1), :]
    amask = p_ref[pl.ds(r_vec + 5, 1), :]  # 1.0 on action columns, else 0.0

    # Block 1: Linear (bias cancelled by BN) -> BN -> ReLU.  Padded columns
    # stay exactly 0 through BN/ReLU (gamma/beta padding is 0).
    h = jnp.dot(x, w1, preferred_element_type=jnp.float32)
    h = _bn_relu(h, g1, be1)
    # Block 2: Linear (bias cancelled by BN) -> BN -> ReLU.
    h = jnp.dot(h, w2, preferred_element_type=jnp.float32)
    h = _bn_relu(h, g2, be2)
    # Output layer; columns >= out_dim remain exactly 0.
    raw = jnp.dot(h, wo, preferred_element_type=jnp.float32) + bo
    # tanh only on the action columns; state columns pass through.
    out_ref[...] = jnp.where(amask > 0.5, jnp.tanh(raw), raw)


def prepare_params(params, *, ac_dim):
    """One-time packing (outside the hot path) of all parameters into a single
    lane-dense (rows, 128) f32 buffer:

        rows [0, K1)            W1   (K1 x H1), cols zero-padded to 128
        rows [r_w2, r_w2+128)   W2   (H1 x H2), rows/cols zero-padded to 128
        rows [r_wo, r_wo+128)   Wo   (H2 x out_dim), rows/cols zero-padded
        row   r_vec + 0..3      gamma1, beta1, gamma2, beta2
        row   r_vec + 4         output bias bo
        row   r_vec + 5         tanh mask (1.0 for cols < ac_dim)

    Linear biases b1/b2 are intentionally dropped (cancelled by training-mode
    BatchNorm's mean subtraction).
    """
    w1, b1, g1, be1, w2, b2, g2, be2, wo, bo = params
    del b1, b2  # exactly cancelled by BN mean subtraction
    k1, h1 = w1.shape
    h1b, h2 = w2.shape
    h2b, out_dim = wo.shape
    assert h1b == h1 and h2b == h2
    assert h1 <= LANE and h2 <= LANE and out_dim <= LANE

    r_w2 = _round_up(k1, SUBLANE)
    r_wo = r_w2 + LANE
    r_vec = r_wo + LANE
    rows = r_vec + SUBLANE

    buf = jnp.zeros((rows, LANE), jnp.float32)
    buf = buf.at[0:k1, 0:h1].set(w1.astype(jnp.float32))
    buf = buf.at[r_w2:r_w2 + h1, 0:h2].set(w2.astype(jnp.float32))
    buf = buf.at[r_wo:r_wo + h2, 0:out_dim].set(wo.astype(jnp.float32))
    buf = buf.at[r_vec + 0, 0:h1].set(g1.reshape(-1).astype(jnp.float32))
    buf = buf.at[r_vec + 1, 0:h1].set(be1.reshape(-1).astype(jnp.float32))
    buf = buf.at[r_vec + 2, 0:h2].set(g2.reshape(-1).astype(jnp.float32))
    buf = buf.at[r_vec + 3, 0:h2].set(be2.reshape(-1).astype(jnp.float32))
    buf = buf.at[r_vec + 4, 0:out_dim].set(bo.reshape(-1).astype(jnp.float32))
    amask = (jnp.arange(LANE) < ac_dim).astype(jnp.float32)
    buf = buf.at[r_vec + 5, :].set(amask)

    meta = {"k1": k1, "r_w2": r_w2, "r_wo": r_wo, "r_vec": r_vec}
    return buf, meta


def one_step_generator_fc(z, x, g, packed_params, meta, *, ac_dim, state_dim):
    """Pallas implementation of OneStepGeneratorFC.forward (training-mode BN).

    Returns (tanh(actions), states, None) like the PyTorch module."""
    B = z.shape[0]
    inp = jnp.concatenate([z, x, g], axis=-1)  # (B, k1); tiny, one XLA op

    kernel = functools.partial(one_step_generator_kernel,
                               meta["k1"], meta["r_w2"],
                               meta["r_wo"], meta["r_vec"])
    out = pl.pallas_call(
        kernel,
        out_shape=jax.ShapeDtypeStruct((B, LANE), jnp.float32),
        in_specs=[pl.BlockSpec(memory_space=pltpu.MemorySpace.VMEM),
                  pl.BlockSpec(memory_space=pltpu.MemorySpace.VMEM)],
        out_specs=pl.BlockSpec(memory_space=pltpu.MemorySpace.VMEM),
    )(inp, packed_params)

    actions = out[:, :ac_dim]
    states = out[:, ac_dim:ac_dim + state_dim]
    return actions, states, None


def init_params(key, input_dim, hidden_sizes, out_dim):
    """Deterministic PyTorch-like init: U(-1/sqrt(fan_in), 1/sqrt(fan_in)).
    Linear weights stored pre-transposed as (in_features, out_features)."""
    params = []
    dims = [input_dim] + list(hidden_sizes)
    keys = jax.random.split(key, 2 * len(hidden_sizes) + 2)
    ki = 0
    for i in range(len(hidden_sizes)):
        fan_in = dims[i]
        bound = 1.0 / jnp.sqrt(fan_in)
        w = jax.random.uniform(keys[ki], (dims[i], dims[i + 1]),
                               jnp.float32, -bound, bound); ki += 1
        b = jax.random.uniform(keys[ki], (1, dims[i + 1]),
                               jnp.float32, -bound, bound); ki += 1
        gamma = jnp.ones((1, dims[i + 1]), jnp.float32)
        beta = jnp.zeros((1, dims[i + 1]), jnp.float32)
        params.extend([w, b, gamma, beta])
    fan_in = hidden_sizes[-1]
    bound = 1.0 / jnp.sqrt(fan_in)
    wo = jax.random.uniform(keys[ki], (hidden_sizes[-1], out_dim),
                            jnp.float32, -bound, bound); ki += 1
    bo = jax.random.uniform(keys[ki], (1, out_dim),
                            jnp.float32, -bound, bound)
    params.extend([wo, bo])
    return tuple(params)


def reference_forward(z, x, g, params, *, ac_dim, state_dim):
    """Pure-JAX reference of the same forward (WITH the Linear biases, to
    validate that dropping them under training-mode BN is exact)."""
    inp = jnp.concatenate([z, x, g], axis=-1)
    w1, b1, g1, be1, w2, b2, g2, be2, wo, bo = params
    h = inp @ w1 + b1
    h = _bn_relu(h, g1, be1)
    h = h @ w2 + b2
    h = _bn_relu(h, g2, be2)
    out = h @ wo + bo
    return jnp.tanh(out[:, :ac_dim]), out[:, ac_dim:ac_dim + state_dim], None


if __name__ == "__main__":
    # Small shapes consistent with the module.
    batch = 8
    state_dim, ac_dim, goal_dim, latent_dim = 12, 4, 3, 8
    hidden_sizes = [32, 32]
    input_dim = state_dim + goal_dim + latent_dim
    out_dim = ac_dim + state_dim  # output_state_directly=True

    key = jax.random.PRNGKey(0)
    kz, kx, kg, kp = jax.random.split(key, 4)
    z = jax.random.normal(kz, (batch, latent_dim), jnp.float32)
    x = jax.random.normal(kx, (batch, state_dim), jnp.float32)
    g = jax.random.normal(kg, (batch, goal_dim), jnp.float32)

    params = init_params(kp, input_dim, hidden_sizes, out_dim)
    packed, meta = prepare_params(params, ac_dim=ac_dim)

    actions, states, extra = one_step_generator_fc(
        z, x, g, packed, meta, ac_dim=ac_dim, state_dim=state_dim)
    jax.block_until_ready((actions, states))

    ref_a, ref_s, _ = reference_forward(
        z, x, g, params, ac_dim=ac_dim, state_dim=state_dim)

    assert extra is None
    assert actions.shape == (batch, ac_dim)
    assert states.shape == (batch, state_dim)
    assert jnp.allclose(actions, ref_a, atol=1e-4, rtol=1e-4), \
        float(jnp.max(jnp.abs(actions - ref_a)))
    assert jnp.allclose(states, ref_s, atol=1e-4, rtol=1e-4), \
        float(jnp.max(jnp.abs(states - ref_s)))
    print("KERNEL_OK")
</pallas_src>

<mosaic_0001>
module attributes {stable_mosaic.version = 11 : i64} {
  func.func @one_step_generator_kernel(%arg0: memref<8x23xf32, #tpu.memory_space<vmem>>, %arg1: memref<288x128xf32, #tpu.memory_space<vmem>>, %arg2: memref<8x128xf32, #tpu.memory_space<vmem>>) attributes {dimension_semantics = [], scalar_prefetch = 0 : i64, scratch_operands = 0 : i64, tpu.core_type = #tpu.core_type<tc>} {
    %c0 = arith.constant 0 : index
    %c0_0 = arith.constant 0 : index
    %0 = vector.load %arg0[%c0, %c0_0] : memref<8x23xf32, #tpu.memory_space<vmem>>, vector<8x23xf32>
    %c0_1 = arith.constant 0 : index
    %c0_2 = arith.constant 0 : index
    %1 = vector.load %arg1[%c0_1, %c0_2] : memref<288x128xf32, #tpu.memory_space<vmem>>, vector<23x128xf32>
    %c24 = arith.constant 24 : index
    %c0_3 = arith.constant 0 : index
    %2 = vector.load %arg1[%c24, %c0_3] : memref<288x128xf32, #tpu.memory_space<vmem>>, vector<128x128xf32>
    %c152 = arith.constant 152 : index
    %c0_4 = arith.constant 0 : index
    %3 = vector.load %arg1[%c152, %c0_4] : memref<288x128xf32, #tpu.memory_space<vmem>>, vector<128x128xf32>
    %c280 = arith.constant 280 : index
    %c0_5 = arith.constant 0 : index
    %4 = vector.load %arg1[%c280, %c0_5] : memref<288x128xf32, #tpu.memory_space<vmem>>, vector<1x128xf32>
    %c281 = arith.constant 281 : index
    %c0_6 = arith.constant 0 : index
    %5 = vector.load %arg1[%c281, %c0_6] : memref<288x128xf32, #tpu.memory_space<vmem>>, vector<1x128xf32>
    %c282 = arith.constant 282 : index
    %c0_7 = arith.constant 0 : index
    %6 = vector.load %arg1[%c282, %c0_7] : memref<288x128xf32, #tpu.memory_space<vmem>>, vector<1x128xf32>
    %c283 = arith.constant 283 : index
    %c0_8 = arith.constant 0 : index
    %7 = vector.load %arg1[%c283, %c0_8] : memref<288x128xf32, #tpu.memory_space<vmem>>, vector<1x128xf32>
    %c284 = arith.constant 284 : index
    %c0_9 = arith.constant 0 : index
    %8 = vector.load %arg1[%c284, %c0_9] : memref<288x128xf32, #tpu.memory_space<vmem>>, vector<1x128xf32>
    %c285 = arith.constant 285 : index
    %c0_10 = arith.constant 0 : index
    %9 = vector.load %arg1[%c285, %c0_10] : memref<288x128xf32, #tpu.memory_space<vmem>>, vector<1x128xf32>
    %cst = arith.constant dense<0.000000e+00> : vector<8x128xf32>
    %10 = tpu.matmul %0, %1, %cst {dimension_numbers = #tpu.dot_dimension_numbers<[1], [0], [0], [1], [0, 0, 1, 1], [], []>} : vector<8x23xf32>, vector<23x128xf32>, vector<8x128xf32> -> vector<8x128xf32>
    %cst_11 = arith.constant dense<0.000000e+00> : vector<128xf32>
    %11 = vector.multi_reduction <add>, %10, %cst_11 [0] : vector<8x128xf32> to vector<128xf32>
    %12 = vector.shape_cast %11 : vector<128xf32> to vector<1x128xf32>
    %cst_12 = arith.constant 8.000000e+00 : f32
    %13 = vector.broadcast %cst_12 : f32 to vector<1x128xf32>
    %14 = arith.divf %12, %13 : vector<1x128xf32>
    %15 = vector.broadcast %14 : vector<1x128xf32> to vector<8x128xf32>
    %16 = arith.subf %10, %15 : vector<8x128xf32>
    %17 = arith.mulf %16, %16 : vector<8x128xf32>
    %cst_13 = arith.constant dense<0.000000e+00> : vector<128xf32>
    %18 = vector.multi_reduction <add>, %17, %cst_13 [0] : vector<8x128xf32> to vector<128xf32>
    %19 = vector.shape_cast %18 : vector<128xf32> to vector<1x128xf32>
    %cst_14 = arith.constant 8.000000e+00 : f32
    %20 = vector.broadcast %cst_14 : f32 to vector<1x128xf32>
    %21 = arith.divf %19, %20 : vector<1x128xf32>
    %22 = vector.broadcast %14 : vector<1x128xf32> to vector<8x128xf32>
    %23 = arith.subf %10, %22 : vector<8x128xf32>
    %cst_15 = arith.constant 9.99999974E-6 : f32
    %24 = vector.broadcast %cst_15 : f32 to vector<1x128xf32>
    %25 = arith.addf %21, %24 : vector<1x128xf32>
    %26 = math.rsqrt %25 : vector<1x128xf32>
    %27 = vector.broadcast %26 : vector<1x128xf32> to vector<8x128xf32>
    %28 = arith.mulf %23, %27 : vector<8x128xf32>
    %29 = vector.broadcast %4 : vector<1x128xf32> to vector<8x128xf32>
    %30 = arith.mulf %28, %29 : vector<8x128xf32>
    %31 = vector.broadcast %5 : vector<1x128xf32> to vector<8x128xf32>
    %32 = arith.addf %30, %31 : vector<8x128xf32>
    %cst_16 = arith.constant 0.000000e+00 : f32
    %33 = vector.broadcast %cst_16 : f32 to vector<8x128xf32>
    %34 = arith.maximumf %32, %33 : vector<8x128xf32>
    %cst_17 = arith.constant dense<0.000000e+00> : vector<8x128xf32>
    %35 = tpu.matmul %34, %2, %cst_17 {dimension_numbers = #tpu.dot_dimension_numbers<[1], [0], [0], [1], [0, 0, 1, 1], [], []>} : vector<8x128xf32>, vector<128x128xf32>, vector<8x128xf32> -> vector<8x128xf32>
    %cst_18 = arith.constant dense<0.000000e+00> : vector<128xf32>
    %36 = vector.multi_reduction <add>, %35, %cst_18 [0] : vector<8x128xf32> to vector<128xf32>
    %37 = vector.shape_cast %36 : vector<128xf32> to vector<1x128xf32>
    %cst_19 = arith.constant 8.000000e+00 : f32
    %38 = vector.broadcast %cst_19 : f32 to vector<1x128xf32>
    %39 = arith.divf %37, %38 : vector<1x128xf32>
    %40 = vector.broadcast %39 : vector<1x128xf32> to vector<8x128xf32>
    %41 = arith.subf %35, %40 : vector<8x128xf32>
    %42 = arith.mulf %41, %41 : vector<8x128xf32>
    %cst_20 = arith.constant dense<0.000000e+00> : vector<128xf32>
    %43 = vector.multi_reduction <add>, %42, %cst_20 [0] : vector<8x128xf32> to vector<128xf32>
    %44 = vector.shape_cast %43 : vector<128xf32> to vector<1x128xf32>
    %cst_21 = arith.constant 8.000000e+00 : f32
    %45 = vector.broadcast %cst_21 : f32 to vector<1x128xf32>
    %46 = arith.divf %44, %45 : vector<1x128xf32>
    %47 = vector.broadcast %39 : vector<1x128xf32> to vector<8x128xf32>
    %48 = arith.subf %35, %47 : vector<8x128xf32>
    %cst_22 = arith.constant 9.99999974E-6 : f32
    %49 = vector.broadcast %cst_22 : f32 to vector<1x128xf32>
    %50 = arith.addf %46, %49 : vector<1x128xf32>
    %51 = math.rsqrt %50 : vector<1x128xf32>
    %52 = vector.broadcast %51 : vector<1x128xf32> to vector<8x128xf32>
    %53 = arith.mulf %48, %52 : vector<8x128xf32>
    %54 = vector.broadcast %6 : vector<1x128xf32> to vector<8x128xf32>
    %55 = arith.mulf %53, %54 : vector<8x128xf32>
    %56 = vector.broadcast %7 : vector<1x128xf32> to vector<8x128xf32>
    %57 = arith.addf %55, %56 : vector<8x128xf32>
    %cst_23 = arith.constant 0.000000e+00 : f32
    %58 = vector.broadcast %cst_23 : f32 to vector<8x128xf32>
    %59 = arith.maximumf %57, %58 : vector<8x128xf32>
    %cst_24 = arith.constant dense<0.000000e+00> : vector<8x128xf32>
    %60 = tpu.matmul %59, %3, %cst_24 {dimension_numbers = #tpu.dot_dimension_numbers<[1], [0], [0], [1], [0, 0, 1, 1], [], []>} : vector<8x128xf32>, vector<128x128xf32>, vector<8x128xf32> -> vector<8x128xf32>
    %61 = vector.broadcast %8 : vector<1x128xf32> to vector<8x128xf32>
    %62 = arith.addf %60, %61 : vector<8x128xf32>
    %cst_25 = arith.constant 5.000000e-01 : f32
    %63 = vector.broadcast %cst_25 : f32 to vector<1x128xf32>
    %64 = arith.cmpf ogt, %9, %63 : vector<1x128xf32>
    %65 = math.tanh %62 : vector<8x128xf32>
    %66 = vector.shape_cast %64 : vector<1x128xi1> to vector<1x128xi1>
    %67 = vector.broadcast %66 : vector<1x128xi1> to vector<8x128xi1>
    %68 = arith.select %67, %65, %62 : vector<8x128xi1>, vector<8x128xf32>
    %c0_26 = arith.constant 0 : index
    %c0_27 = arith.constant 0 : index
    %69 = vector.load %arg2[%c0_26, %c0_27] : memref<8x128xf32, #tpu.memory_space<vmem>>, vector<8x128xf32>
    tpu.vector_store %arg2[%c0_26, %c0_27], %68 {strides = array<i32>} : memref<8x128xf32, #tpu.memory_space<vmem>>, vector<8x128xf32>,
    return
  }
}

</mosaic_0001>

<bundles_post_ra>
// kernel: tpu_custom_call.1
= control target key start
LH: loop header
LB: loop body
LE: loop exit
PB: predicated region body
PF: predicated region fallthrough
CT: control target
= control target key end

     0   :  { %7 = vsyncpa [#allocation3], 0  ;;  %s738_s0 = inlined_call_operand.hbm [shape: f32[8,23], index: 0, kind: input, shape index: {}]   ;;  %s739_s1 = inlined_call_operand.hbm [shape: f32[288,128], index: 1, kind: input, shape index: {}]   ;;  %s740_s2 = inlined_call_operand.hbm [shape: f32[8,128], index: 2, kind: output, shape index: {}]  }
   0x1   :  { %8 = vsyncpa [#allocation6], 0 }
   0x2   :  { %9 = vsyncpa [#allocation4], 0  ;;  %s651_s9 = smov [#allocation2]   ;;  %s652_s11 = smov [#allocation5]  }
   0x3   :  { %s16_s10 = sshll.u32 %s651_s9, 4  ;;  %s25_s12 = sshll.u32 %s652_s11, 4  ;;  %s17_s10 = int_to_ptr.vmem [resolvable:$true] %s16_s10  ;;  %s675_s12 = int_to_ptr.vmem [resolvable:$true] %s25_s12 }
   0x4   :  { %s579_s15 = scalar_lea.hbm %s738_s0, 128 }
   0x5   :  { %p580_p0 = scmp.ne.s32.totalorder %s738_s0, %s579_s15  ;;  %p583_p1 = scmp.lt.u32.totalorder %s579_s15, %s738_s0 }
   0x7   :  { %p585_p2 = pnand %p583_p1, %p580_p0 }
   0x9   :  { %588 = shalt.err (!%p585_p2)
}
   0xa   :  { %s589_s20 = scalar_lea.vmem %s17_s10, 128  ;;  %p594_p4 = scmp.lt.s32.totalorder %s17_s10, %s17_s10 }
   0xb   :  { %p590_p3 = scmp.ne.s32.totalorder %s17_s10, %s589_s20  ;;  %p595_p5 = scmp.lt.s32.totalorder %s589_s20, %s589_s20 }
   0xd   :  { %p596_p6 = por %p595_p5, %p594_p4 }
   0xf   :  { %p597_p7 = pnand %p596_p6, %p590_p3 }
  0x11   :  { %600 = shalt.err (!%p597_p7)
}
  0x12   :  { %19 = dma.hbm_to_vmem [thread:$0]  %s738_s0, 128, %s17_s10, [#allocation3]  }
  0x13   :  { %s601_s25 = scalar_lea.hbm %s739_s1, 4608 }
  0x14   :  { %p602_p8 = scmp.ne.s32.totalorder %s739_s1, %s601_s25  ;;  %p605_p9 = scmp.lt.u32.totalorder %s601_s25, %s739_s1 }
  0x16   :  { %p607_p10 = pnand %p605_p9, %p602_p8 }
  0x18   :  { %610 = shalt.err (!%p607_p10)
}
  0x19   :  { %s611_s30 = scalar_lea.vmem %s675_s12, 4608  ;;  %p616_p12 = scmp.lt.s32.totalorder %s675_s12, %s675_s12 }
  0x1a   :  { %p612_p11 = scmp.ne.s32.totalorder %s675_s12, %s611_s30  ;;  %p617_p13 = scmp.lt.s32.totalorder %s611_s30, %s611_s30 }
  0x1c   :  { %p618_p0 = por %p617_p13, %p616_p12 }
  0x1e   :  { %p619_p1 = pnand %p618_p0, %p612_p11 }
  0x20   :  { %622 = shalt.err (!%p619_p1)
}
  0x21   :  { %s653_s0 = smov 128   ;;  %s654_s3 = smov 8  }
  0x22   :  { %31 = dma.hbm_to_vmem [thread:$0]  %s739_s1, 4608, %s675_s12, [#allocation6], %s653_s0, %s653_s0, %s654_s3  }
  0x23   :  { %645 = dma.done.wait [#allocation3], 128  }
  0x24   :  { %646 = vsyncadd [#allocation3], 4294967168 }
  0x25   :  { %647 = dma.done.wait [#allocation6], 4608  }
  0x26   :  { %648 = vsyncadd [#allocation6], 4294962688  ;;  %v655_v0 = vmov 0.0|0.0   ;;  %vm656_vm0 = vmmov 0   ;;  %v657_v1 = vmov 0.0   ;;  %v39_v2 = vld [vmem:[#allocation5] sm:$0xff] }
  0x27   :  { %513 = vmatprep.subr.bf16.mxu0 %v655_v0  ;;  %440 = vmatprep.mubr.msk.f32.mxu0 %vm656_vm0, %v657_v1  ;;  %v40_v3 = vld [vmem:[#allocation5 + $0x8] sm:$0xff]  ;;  %v41_v5 = vld [vmem:[#allocation5 + $0x10] sm:$0x7f]  ;;  %vm84_vm1 = vcmask 1046528   ;;  %v38_v6 = vld [vmem:[#allocation2] sm:$0xff]  ;;  %vm80_vm2 = vcmask 187392  }
  0x28   :  { %516 = vmatprep.subr.bf16.mxu1 %v655_v0  ;;  %475 = vmatprep.mubr.msk.f32.mxu1 %vm656_vm0, %v657_v1  ;;  %v514_v4 = vpack.c.bf16 %v40_v3, %v39_v2  ;;  %v42_v7 = vld [vmem:[#allocation5 + $0x18] sm:$0xff]  ;;  %v43_v8 = vld [vmem:[#allocation5 + $0x20] sm:$0xff]  ;;  %v44_v10 = vld [vmem:[#allocation5 + $0x28] sm:$0xff]  ;;  %s659_s1 = smov [#allocation7]  }
  0x29   :  { %v517_v9 = vpack.c.bf16 %v43_v8, %v42_v7  ;;  %v45_v11 = vld [vmem:[#allocation5 + $0x30] sm:$0xff]  ;;  %v46_v13 = vld [vmem:[#allocation5 + $0x38] sm:$0xff]  ;;  %v47_v14 = vld [vmem:[#allocation5 + $0x40] sm:$0xff]  ;;  %s379_s6 = sshll.u32 %s659_s1, 4  ;;  %s380_s6 = int_to_ptr.vmem [resolvable:$true] %s379_s6 }
  0x2a   :  { %515 = vmatpush3.bf16.msra.mxu0 %v514_v4  ;;  %v520_v12 = vpack.c.bf16 %v45_v11, %v44_v10  ;;  %v523_v15 = vpack.c.bf16 %v47_v14, %v46_v13  ;;  %v48_v16 = vld [vmem:[#allocation5 + $0x48] sm:$0xff]  ;;  %v49_v17 = vld [vmem:[#allocation5 + $0x50] sm:$0xff]  ;;  %v50_v19 = vld [vmem:[#allocation5 + $0x58] sm:$0xff]  ;;  %s623_s7 = scalar_lea.vmem %s380_s6, 128  ;;  %p628_p3 = scmp.lt.s32.totalorder %s380_s6, %s380_s6 }
  0x2b   :  { %438 = vmatprep.subr.mxu0 %v657_v1  ;;  %518 = vmatpush3.bf16.msra.mxu1 %v517_v9  ;;  %v526_v18 = vpack.c.bf16 %v49_v17, %v48_v16  ;;  %v51_v20 = vld [vmem:[#allocation5 + $0x60] sm:$0xff]  ;;  %v52_v22 = vld [vmem:[#allocation5 + $0x68] sm:$0xff]  ;;  %v53_v23 = vld [vmem:[#allocation5 + $0x70] sm:$0xff]  ;;  %p624_p2 = scmp.ne.s32.totalorder %s380_s6, %s623_s7  ;;  %p629_p4 = scmp.lt.s32.totalorder %s623_s7, %s623_s7 }
  0x2c   :  { %519 = vmatprep.subr.bf16.mxu1 %v655_v0  ;;  %v529_v21 = vpack.c.bf16 %v51_v20, %v50_v19  ;;  %v532_v24 = vpack.c.bf16 %v53_v23, %v52_v22  ;;  %v54_v25 = vld [vmem:[#allocation5 + $0x78] sm:$0xff]  ;;  %v55_v26 = vld [vmem:[#allocation5 + $0x80] sm:$0xff]  ;;  %v56_v28 = vld [vmem:[#allocation5 + $0x88] sm:$0xff] }
  0x2d   :  { %v535_v27 = vpack.c.bf16 %v55_v26, %v54_v25  ;;  %v57_v29 = vld [vmem:[#allocation5 + $0x90] sm:$0xff]  ;;  %v391_v51 = vld [vmem:[#allocation5 + $0x118] ss:$0 sm:$0xff]  ;;  %v392_v53 = vld [vmem:[#allocation5 + $0x119] ss:$0 sm:$0xff]  ;;  %p630_p5 = por %p629_p4, %p628_p3 }
  0x2e   :  { %439 = vmatpush3.msk.msra.mxu0 %vm84_vm1, %v41_v5  ;;  %v538_v30 = vpack.c.bf16 %v57_v29, %v56_v28  ;;  %v58_v57 = vld [vmem:[#allocation5 + $0x98] sm:$0xff]  ;;  %v59_v58 = vld [vmem:[#allocation5 + $0xa0] sm:$0xff]  ;;  %v60_v60 = vld [vmem:[#allocation5 + $0xa8] sm:$0xff] }
  0x2f   :  { %441 = vmatmul.mubr.msk.f32.vlgmr.msra.gmra.mrb[0].mxu0 %vm80_vm2, %v38_v6  ;;  %540 = vmatprep.subr.bf16.mxu0 %v655_v0  ;;  %v541_v59 = vpack.c.bf16 %v59_v58, %v58_v57  ;;  %v61_v61 = vld [vmem:[#allocation5 + $0xb0] sm:$0xff]  ;;  %v62_v63 = vld [vmem:[#allocation5 + $0xb8] sm:$0xff]  ;;  %v64_v3 = vld [vmem:[#allocation5 + $0xc8] sm:$0xff]  ;;  %p631_p6 = pnand %p630_p5, %p624_p2 }
  0x30   :  { %510 = vmatprep.mubr.msk.f32.mxu0 %vm656_vm0, %v657_v1  ;;  %521 = vmatpush3.bf16.msra.mxu1 %v520_v12  ;;  %v544_v62 = vpack.c.bf16 %v61_v61, %v60_v60  ;;  %v63_v1 = vld [vmem:[#allocation5 + $0xc0] sm:$0xff]  ;;  %v65_v4 = vld [vmem:[#allocation5 + $0xd0] sm:$0xff]  ;;  %v66_v6 = vld [vmem:[#allocation5 + $0xd8] sm:$0xff] }
  0x31   :  { %522 = vmatprep.subr.bf16.mxu1 %v655_v0  ;;  %542 = vmatpush3.bf16.msra.mxu0 %v541_v59  ;;  %v547_v2 = vpack.c.bf16 %v63_v1, %v62_v63  ;;  %v550_v5 = vpack.c.bf16 %v65_v4, %v64_v3  ;;  %v67_v7 = vld [vmem:[#allocation5 + $0xe0] sm:$0xff]  ;;  %v68_v9 = vld [vmem:[#allocation5 + $0xe8] sm:$0xff]  ;;  %v69_v10 = vld [vmem:[#allocation5 + $0xf0] sm:$0xff] }
  0x32   :  { %543 = vmatprep.subr.bf16.mxu0 %v655_v0  ;;  %v553_v8 = vpack.c.bf16 %v67_v7, %v66_v6  ;;  %v556_v11 = vpack.c.bf16 %v69_v10, %v68_v9  ;;  %v70_v12 = vld [vmem:[#allocation5 + $0xf8] sm:$0xff]  ;;  %v71_v13 = vld [vmem:[#allocation5 + $0x100] sm:$0xff]  ;;  %v73_v16 = vld [vmem:[#allocation5 + $0x110] sm:$0xff] }
  0x33   :  { %v559_v14 = vpack.c.bf16 %v71_v13, %v70_v12 }
  0x34   :  { %524 = vmatpush3.bf16.msra.mxu1 %v523_v15  ;;  %v72_v15 = vld [vmem:[#allocation5 + $0x108] sm:$0xff] }
  0x35   :  { %525 = vmatprep.subr.bf16.mxu1 %v655_v0  ;;  %545 = vmatpush3.bf16.msra.mxu0 %v544_v62  ;;  %v562_v17 = vpack.c.bf16 %v73_v16, %v72_v15 }
  0x36   :  { %546 = vmatprep.subr.bf16.mxu0 %v655_v0 }
  0x38   :  { %527 = vmatpush3.bf16.msra.mxu1 %v526_v18 }
  0x39   :  { %528 = vmatprep.subr.bf16.mxu1 %v655_v0  ;;  %548 = vmatpush3.bf16.msra.mxu0 %v547_v2 }
  0x3a   :  { %549 = vmatprep.subr.bf16.mxu0 %v655_v0 }
  0x3c   :  { %530 = vmatpush3.bf16.msra.mxu1 %v529_v21 }
  0x3d   :  { %531 = vmatprep.subr.bf16.mxu1 %v655_v0  ;;  %551 = vmatpush3.bf16.msra.mxu0 %v550_v5 }
  0x3e   :  { %552 = vmatprep.subr.bf16.mxu0 %v655_v0 }
  0x40   :  { %533 = vmatpush3.bf16.msra.mxu1 %v532_v24 }
  0x41   :  { %534 = vmatprep.subr.bf16.mxu1 %v655_v0  ;;  %554 = vmatpush3.bf16.msra.mxu0 %v553_v8 }
  0x42   :  { %555 = vmatprep.subr.bf16.mxu0 %v655_v0 }
  0x44   :  { %536 = vmatpush3.bf16.msra.mxu1 %v535_v27 }
  0x45   :  { %537 = vmatprep.subr.bf16.mxu1 %v655_v0  ;;  %557 = vmatpush3.bf16.msra.mxu0 %v556_v11 }
  0x46   :  { %558 = vmatprep.subr.bf16.mxu0 %v655_v0 }
  0x48   :  { %539 = vmatpush3.bf16.msra.mxu1 %v538_v30 }
  0x49   :  { %560 = vmatpush3.bf16.msra.mxu0 %v559_v14 }
  0x4a   :  { %561 = vmatprep.subr.bf16.mxu0 %v655_v0 }
  0x4d   :  { %563 = vmatpush3.bf16.msra.mxu0 %v562_v17 }
 0x102   :  { %v154_v31 = vpop.f32.mrb[0].mxu0 }
 0x103   :  { %v158_v32 = vrot.slane %v154_v31, 4  ;;  %v442_v33 = vpop.f32.mrb[1].mxu0 }
 0x105   :  { %v159_v34 = vadd.f32 %v158_v32, %v154_v31 }
 0x107   :  { %v160_v35 = vrot.slane %v159_v34, 2 }
 0x109   :  { %v161_v36 = vadd.f32 %v160_v35, %v159_v34 }
 0x10b   :  { %v162_v37 = vrot.slane %v161_v36, 1 }
 0x10d   :  { %v163_v38 = vadd.f32 %v162_v37, %v161_v36  ;;  %v393_v37 = vld [vmem:[#allocation5 + $0x11a] ss:$0 sm:$0xff] }
 0x10f   :  { %v165_v39 = vmul.f32 0.125, %v163_v38 }
 0x111   :  { %v166_v40 = vsub.f32 %v154_v31, %v165_v39  ;;  %v394_v39 = vld [vmem:[#allocation5 + $0x11b] ss:$0 sm:$0xff] }
 0x113   :  { %v167_v41 = vmul.f32 %v166_v40, %v166_v40 }
 0x115   :  { %v168_v42 = vrot.slane %v167_v41, 4 }
 0x117   :  { %v169_v43 = vadd.f32 %v168_v42, %v167_v41 }
 0x119   :  { %v170_v44 = vrot.slane %v169_v43, 2 }
 0x11b   :  { %v171_v45 = vadd.f32 %v170_v44, %v169_v43  ;;  %v366_v43 = vlaneseq  ;;  %v395_v44 = vld [vmem:[#allocation5 + $0x11c] ss:$0 sm:$0xff] }
 0x11d   :  { %v172_v46 = vrot.slane %v171_v45, 1 }
 0x11f   :  { %v173_v47 = vadd.f32 %v172_v46, %v171_v45  ;;  %v79_v45 = vld [vmem:[#allocation5 + $0x11d] sm:$0x1]  ;;  %v367_v46 = vshrl.u32 %v366_v43, 7 }
 0x120   :  { %vm363_vm3 = vcmp.gt.f32.partialorder %v79_v45, 0.5 }
 0x121   :  { %v174_v48 = vmul.f32 0.125, %v173_v47 }
 0x123   :  { %v175_v49 = vadd.f32 1e-05, %v174_v48 }
 0x125   :  { %573 = vrsqrt.f32 %v175_v49 }
 0x12f   :  { %v574_v50 = vpop.eup %573 }
 0x130   :  { %v177_v52 = vmul.f32 %v574_v50, %v166_v40  ;;  %v368_v50 = vsub.s32 0, %v367_v46 }
 0x132   :  { %v182_v54 = vmul.f32 %v391_v51, %v177_v52  ;;  %v658_v51 = vmov 0  }
 0x133   :  { %v365_v52 = vsel %vm363_vm3, 1, %v658_v51 }
 0x134   :  { %v187_v55 = vadd.f32 %v392_v53, %v182_v54  ;;  %v369_v53 = vrot.slane %v365_v52, %v368_v50 }
 0x136   :  { %v188_v56 = vmax.f32 %v187_v55, 0.0  ;;  %vm370_vm4 = vcmp.eq.s32.totalorder %v369_v53, 1 }
 0x138   :  { %476 = vmatmul.mubr.f32.vlgmr.msra.gmra.mrb[0].mxu1 %v188_v56 }
 0x20b   :  { %v255_v18 = vpop.f32.mrb[0].mxu1 }
 0x20c   :  { %v259_v19 = vrot.slane %v255_v18, 4  ;;  %v477_v20 = vpop.f32.mrb[1].mxu1 }
 0x20e   :  { %v260_v21 = vadd.f32 %v259_v19, %v255_v18 }
 0x210   :  { %v261_v22 = vrot.slane %v260_v21, 2 }
 0x212   :  { %v262_v23 = vadd.f32 %v261_v22, %v260_v21 }
 0x214   :  { %v263_v24 = vrot.slane %v262_v23, 1 }
 0x216   :  { %v264_v25 = vadd.f32 %v263_v24, %v262_v23 }
 0x218   :  { %v265_v26 = vmul.f32 0.125, %v264_v25 }
 0x21a   :  { %v266_v27 = vsub.f32 %v255_v18, %v265_v26 }
 0x21c   :  { %v267_v28 = vmul.f32 %v266_v27, %v266_v27 }
 0x21e   :  { %v268_v29 = vrot.slane %v267_v28, 4 }
 0x220   :  { %v269_v30 = vadd.f32 %v268_v29, %v267_v28 }
 0x222   :  { %v270_v31 = vrot.slane %v269_v30, 2 }
 0x224   :  { %v271_v32 = vadd.f32 %v270_v31, %v269_v30 }
 0x226   :  { %v272_v0 = vrot.slane %v271_v32, 1 }
 0x228   :  { %v273_v33 = vadd.f32 %v272_v0, %v271_v32 }
 0x22a   :  { %v274_v34 = vmul.f32 0.125, %v273_v33 }
 0x22c   :  { %v275_v35 = vadd.f32 1e-05, %v274_v34 }
 0x22e   :  { %575 = vrsqrt.f32 %v275_v35 }
 0x238   :  { %v576_v36 = vpop.eup %575 }
 0x239   :  { %v277_v38 = vmul.f32 %v576_v36, %v266_v27 }
 0x23b   :  { %v282_v40 = vmul.f32 %v393_v37, %v277_v38 }
 0x23d   :  { %v287_v41 = vadd.f32 %v394_v39, %v282_v40 }
 0x23f   :  { %v288_v42 = vmax.f32 %v287_v41, 0.0 }
 0x241   :  { %511 = vmatmul.mubr.f32.vlgmr.msra.gmra.mrb[2].mxu0 %v288_v42 }
 0x314   :  { %v359_v47 = vpop.f32.mrb[2].mxu0 }
 0x315   :  { %v360_v48 = vadd.f32 %v395_v44, %v359_v47  ;;  %v512_v49 = vpop.f32.mrb[3].mxu0 }
 0x317   :  { %577 = vtanh.f32 %v360_v48 }
 0x321   :  { %v578_v54 = vpop.eup %577 }
 0x322   :  { %v371_v55 = vsel %vm370_vm4, %v578_v54, %v360_v48 }
 0x323   :  { %372 = vst [vmem:[#allocation7] sm:$0xff] %v371_v55 }
 0x324   :  { %634 = shalt.err (!%p631_p6)
}
 0x325   :  { %s635_s10 = scalar_lea.hbm %s740_s2, 128 }
 0x326   :  { %p636_p7 = scmp.ne.s32.totalorder %s740_s2, %s635_s10  ;;  %p639_p8 = scmp.lt.u32.totalorder %s635_s10, %s740_s2 }
 0x328   :  { %p641_p9 = pnand %p639_p8, %p636_p7 }
 0x32a   :  { %644 = shalt.err (!%p641_p9)
}
 0x32b   :  { %382 = dma.vmem_to_hbm [thread:$0]  %s380_s6, 128, %s740_s2, [#allocation4]  }
 0x32c   :  { %649 = dma.done.wait [#allocation4], 128  }
 0x32d   :  { %650 = vsyncadd [#allocation4], 4294967168 }
 0x32e   :  { %386 = vsyncpa [#allocation3], 1 }
 0x32f   :  { %387 = vsyncpa [#allocation6], 1 }
 0x330   :  { %388 = vsyncpa [#allocation4], 1 }

</bundles_post_ra>
